<compile_context>
chip_gen: v7x
topology: tpu7x:2x2x1
jax: 0.10.0
libtpu: 0.0.40
codegen_flags: <defaults>
</compile_context>

<pallas_src>
import numpy as np
import jax
import jax.numpy as jnp
from jax.experimental import pallas as pl
from jax.experimental.pallas import tpu as pltpu


# ---------------------------------------------------------------------------
# Host-side (numpy) weight construction — trace-time constants, no device ops.
# ---------------------------------------------------------------------------
def _resize_matrix_np(in_size: int, out_size: int) -> np.ndarray:
    """Interpolation matrix matching torch F.interpolate(mode='bilinear',
    align_corners=False, antialias=False)."""
    scale = in_size / out_size
    o = np.arange(out_size, dtype=np.float32)
    src = (o + 0.5) * scale - 0.5
    src = np.maximum(src, 0.0)                       # PyTorch clamps negative src
    i0 = np.minimum(np.floor(src).astype(np.int64), in_size - 1)
    i1 = np.minimum(i0 + 1, in_size - 1)
    frac = (src - i0).astype(np.float32)
    w = np.zeros((out_size, in_size), np.float32)
    rows = np.arange(out_size)
    np.add.at(w, (rows, i0), 1.0 - frac)
    np.add.at(w, (rows, i1), frac)
    return w


def _pad_lanes(n: int) -> int:
    """Pad n to a multiple of 128 when the overhead is <= 12.5% (lane-dense,
    unmasked stores); otherwise keep it (padding a tiny last dim to 128 would
    inflate HBM writes too much)."""
    n_pad = pl.cdiv(n, 128) * 128
    return n_pad if (n_pad - n) * 8 <= n else n


# ---------------------------------------------------------------------------
# Blocking / VMEM budgeting.
# ---------------------------------------------------------------------------
_BLOCK_BUDGET_BYTES = 24 * 1024 * 1024   # pipelined blocks + weights + scratch
_VMEM_LIMIT_CAP = 32 * 1024 * 1024       # safe scoped-VMEM cap on v5e/v6e/v7x


def _choose_blocking(nplanes, per_plane_bytes, fixed_bytes, align):
    """Pick (planes_per_block, num_blocks).

    Blocks are sized against an explicit VMEM budget that already includes the
    weight footprint (`fixed_bytes`).  When there is enough work, the plane
    axis is split into an even number of near-equal blocks so both v7x
    TensorCores get balanced work under dimension_semantics=("parallel",).
    """
    avail = max(_BLOCK_BUDGET_BYTES - fixed_bytes, per_plane_bytes)
    b_cap = max(1, avail // per_plane_bytes)
    if b_cap >= align:
        b_cap = (b_cap // align) * align
    if nplanes < 32 and nplanes <= b_cap:
        return nplanes, 1                            # one full-extent block
    num_blocks = max(2, pl.cdiv(nplanes, b_cap))
    if num_blocks % 2:
        num_blocks += 1                              # balanced across 2 TCs
    while True:
        b = pl.cdiv(nplanes, num_blocks)
        if b > align:
            b = pl.cdiv(b, align) * align            # sublane-pack friendly
        if b <= b_cap or num_blocks >= nplanes:
            break
        num_blocks += 2
    b = max(1, min(b, nplanes))
    return b, pl.cdiv(nplanes, b)


def _vmem_limit(total_block_bytes: int) -> int:
    return int(min(_VMEM_LIMIT_CAP,
                   max(16 << 20, int(1.25 * total_block_bytes) + (2 << 20))))


def _weight_spec(shape, single_buffer):
    """Grid-invariant weight block: request single-buffering (it is fetched
    once, so double-buffering only wastes VMEM)."""
    index_map = lambda b: (0,) * len(shape)
    if single_buffer:
        return pl.BlockSpec(shape, index_map, pipeline_mode=pl.Buffered(1))
    return pl.BlockSpec(shape, index_map)


# ---------------------------------------------------------------------------
# Kernels.
# ---------------------------------------------------------------------------
def _kron_resize_kernel(x_ref, w_ref, o_ref):
    # x_ref: (B, Hin*Win)     lane-dense block of flattened planes
    # w_ref: (Hin*Win, Npad)  kron(wh, ww).T, grid-invariant
    # o_ref: (B, Npad)        lane-dense output slab
    # Garbage rows of a partial last block are computed then discarded — safe
    # because each output row depends only on its own input row.
    o_ref[...] = jnp.dot(
        x_ref[...].astype(w_ref.dtype), w_ref[...],
        preferred_element_type=jnp.float32,
    ).astype(o_ref.dtype)


def _separable_resize_kernel(x_ref, wwt_ref, wh_ref, o_ref, y_ref):
    # x_ref:   (B, Hin, Win)
    # wwt_ref: (Win, Wpad)    width-pass weight (ww.T, lane-padded)
    # wh_ref:  (Hout, Hin)    height-pass weight
    # o_ref:   (B, Hout, Wpad)
    # y_ref:   (B, Hin, Wpad) VMEM scratch for the width-pass result
    B, H, W = x_ref.shape
    Wp = wwt_ref.shape[1]
    cdt = wwt_ref.dtype
    # Width pass: fold planes*rows into the matmul M dimension (keeps MXU fed).
    y = jnp.dot(x_ref[...].astype(cdt).reshape(B * H, W), wwt_ref[...],
                preferred_element_type=jnp.float32)
    y_ref[...] = y.reshape(B, H, Wp).astype(cdt)
    wh = wh_ref[...]

    # Height pass: one (Hout, Hin) @ (Hin, Wpad) matmul per plane.
    def body(b, carry):
        o_ref[b] = jnp.dot(wh, y_ref[b],
                           preferred_element_type=jnp.float32).astype(o_ref.dtype)
        return carry

    jax.lax.fori_loop(0, B, body, 0)


# ---------------------------------------------------------------------------
# Wrappers.
# ---------------------------------------------------------------------------
def _dense_kron_path(x, H, W, Hout, Wout, compute_dtype, single_buffer_weight):
    N, C = x.shape[0], x.shape[1]
    nplanes = N * C
    K, Nout = H * W, Hout * Wout
    Npad = _pad_lanes(Nout)

    # Wt[h*W + w, o*Wout + p] = wh[o, h] * ww[p, w]   (host constant)
    wh = _resize_matrix_np(H, Hout)
    ww = _resize_matrix_np(W, Wout)
    w_np = np.zeros((K, Npad), np.float32)
    w_np[:, :Nout] = np.einsum("oh,pw->hwop", wh, ww).reshape(K, Nout)
    w_np = w_np.astype(np.dtype(compute_dtype))

    x_flat = x.reshape(nplanes, K)                   # lane-dense input slab
    item = np.dtype(x.dtype).itemsize
    per_plane = 2 * (K + Npad) * item                # double-buffered in+out
    w_budget = 2 * w_np.nbytes                       # conservative (covers fallback)
    align = 16 if compute_dtype == jnp.bfloat16 else 8
    B, num_blocks = _choose_blocking(nplanes, per_plane, w_budget, align)

    cost = pl.CostEstimate(
        flops=int(2 * nplanes * K * Npad),
        transcendentals=0,
        bytes_accessed=int(nplanes * (K + Nout) * item + w_np.nbytes),
    )
    out_flat = pl.pallas_call(
        _kron_resize_kernel,
        out_shape=jax.ShapeDtypeStruct((nplanes, Npad), x.dtype),
        grid_spec=pltpu.PrefetchScalarGridSpec(
            num_scalar_prefetch=0,
            grid=(num_blocks,),
            in_specs=[
                pl.BlockSpec((B, K), lambda b: (b, 0)),
                _weight_spec((K, Npad), single_buffer_weight),
            ],
            out_specs=pl.BlockSpec((B, Npad), lambda b: (b, 0)),
        ),
        compiler_params=pltpu.CompilerParams(
            dimension_semantics=("parallel",),
            vmem_limit_bytes=_vmem_limit(B * per_plane + w_budget),
        ),
        cost_estimate=cost,
    )(x_flat, w_np)

    if Npad != Nout:
        out_flat = out_flat[:, :Nout]
    return out_flat.reshape(N, C, Hout, Wout)


def _separable_path(x, H, W, Hout, Wout, compute_dtype, single_buffer_weight):
    N, C = x.shape[0], x.shape[1]
    nplanes = N * C
    Wpad = _pad_lanes(Wout)

    ww = _resize_matrix_np(W, Wout)                  # (Wout, Win)
    wh = _resize_matrix_np(H, Hout)                  # (Hout, Hin)
    wwt_np = np.zeros((W, Wpad), np.float32)
    wwt_np[:, :Wout] = ww.T
    wwt_np = wwt_np.astype(np.dtype(compute_dtype))
    wh_np = wh.astype(np.dtype(compute_dtype))

    x3 = x.reshape(nplanes, H, W)
    item = np.dtype(x.dtype).itemsize
    citem = np.dtype(compute_dtype).itemsize
    per_plane = (2 * (H * W + Hout * Wpad) * item    # double-buffered in/out
                 + H * Wpad * citem)                 # width-pass scratch
    w_budget = 2 * (wwt_np.nbytes + wh_np.nbytes)
    align = 16 if compute_dtype == jnp.bfloat16 else 8
    B, num_blocks = _choose_blocking(nplanes, per_plane, w_budget, align)

    cost = pl.CostEstimate(
        flops=int(2 * nplanes * Wpad * (H * W + Hout * H)),
        transcendentals=0,
        bytes_accessed=int(nplanes * (H * W + Hout * Wout) * item
                           + wwt_np.nbytes + wh_np.nbytes),
    )
    out = pl.pallas_call(
        _separable_resize_kernel,
        out_shape=jax.ShapeDtypeStruct((nplanes, Hout, Wpad), x.dtype),
        grid_spec=pltpu.PrefetchScalarGridSpec(
            num_scalar_prefetch=0,
            grid=(num_blocks,),
            in_specs=[
                pl.BlockSpec((B, H, W), lambda b: (b, 0, 0)),
                _weight_spec((W, Wpad), single_buffer_weight),
                _weight_spec((Hout, H), single_buffer_weight),
            ],
            out_specs=pl.BlockSpec((B, Hout, Wpad), lambda b: (b, 0, 0)),
            scratch_shapes=[pltpu.VMEM((B, H, Wpad), compute_dtype)],
        ),
        compiler_params=pltpu.CompilerParams(
            dimension_semantics=("parallel",),
            vmem_limit_bytes=_vmem_limit(B * per_plane + w_budget),
        ),
        cost_estimate=cost,
    )(x3, wwt_np, wh_np)

    if Wpad != Wout:
        out = out[:, :, :Wout]
    return out.reshape(N, C, Hout, Wout)


def resize_layer(x, target_height, target_width, *, force_separable=None):
    """Equivalent of ResizeLayer(target_height, target_width)(x) for NCHW x.

    Matches torch.nn.functional.interpolate(x, size=(th, tw), mode='bilinear',
    align_corners=False) with the default antialias=False (downsampling does
    not low-pass filter).
    """
    N, C, H, W = x.shape
    Hout, Wout = int(target_height), int(target_width)
    if (H, W) == (Hout, Wout):
        return x                                     # weights reduce to identity

    # bf16 inputs stay bf16 on the MXU (half the HBM/VMEM traffic); f32 accum
    # is kept either way via preferred_element_type.
    compute_dtype = jnp.bfloat16 if x.dtype == jnp.bfloat16 else jnp.float32

    kron_bytes = H * W * _pad_lanes(Hout * Wout) * np.dtype(compute_dtype).itemsize
    if force_separable is None:
        use_separable = kron_bytes > (4 << 20)       # dense kron weight too big
    else:
        use_separable = bool(force_separable)
    path = _separable_path if use_separable else _dense_kron_path

    try:
        return path(x, H, W, Hout, Wout, compute_dtype, True)
    except Exception:
        # Some jax versions reject pl.Buffered(1) on top-level BlockSpecs;
        # retry with default double-buffered weights (costs only VMEM).
        return path(x, H, W, Hout, Wout, compute_dtype, False)


if __name__ == "__main__":
    key = jax.random.PRNGKey(0)
    N, C, H, W = 2, 4, 16, 16
    target_height, target_width = 24, 20

    x = jax.random.normal(key, (N, C, H, W), dtype=jnp.float32)

    # Pure-JAX reference (same semantics as torch F.interpolate bilinear,
    # align_corners=False), built from the same host-side matrices.
    wh = jnp.asarray(_resize_matrix_np(H, target_height))
    ww = jnp.asarray(_resize_matrix_np(W, target_width))
    ref = jnp.einsum("oh,nchw,pw->ncop", wh, x, ww)

    # 1) Dense-kron path (the default at these sizes).
    out = jax.block_until_ready(resize_layer(x, target_height, target_width))
    assert out.shape == (N, C, target_height, target_width), out.shape
    assert jnp.allclose(out, ref, atol=1e-4, rtol=1e-4), float(
        jnp.max(jnp.abs(out - ref)))

    # 2) Separable two-matmul path (auto-selected for large spatial sizes).
    out_sep = jax.block_until_ready(
        resize_layer(x, target_height, target_width, force_separable=True))
    assert jnp.allclose(out_sep, ref, atol=1e-4, rtol=1e-4), float(
        jnp.max(jnp.abs(out_sep - ref)))

    # 3) bf16 inputs: weights quantized to bf16, f32 accumulation retained.
    out_bf = jax.block_until_ready(
        resize_layer(x.astype(jnp.bfloat16), target_height, target_width))
    assert out_bf.dtype == jnp.bfloat16
    assert jnp.allclose(out_bf.astype(jnp.float32), ref, atol=6e-2, rtol=6e-2), float(
        jnp.max(jnp.abs(out_bf.astype(jnp.float32) - ref)))

    print("KERNEL_OK")
</pallas_src>

<mosaic_0001>
module attributes {stable_mosaic.version = 11 : i64} {
  func.func @_kron_resize_kernel(%arg0: i32, %arg1: memref<8x256xf32, #tpu.memory_space<vmem>>, %arg2: memref<256x512xf32, #tpu.memory_space<vmem>>, %arg3: memref<8x512xf32, #tpu.memory_space<vmem>>) attributes {dimension_semantics = [#tpu.dimension_semantics<parallel>], iteration_bounds = array<i64: 1>, scalar_prefetch = 0 : i64, scratch_operands = 0 : i64, tpu.core_type = #tpu.core_type<tc>, window_params = [{transform_indices = @transform_0, window_bounds = array<i64: 8, 256>}, {pipeline_mode = #tpu.pipeline_mode<synchronous>, transform_indices = @transform_1, window_bounds = array<i64: 256, 512>}, {transform_indices = @transform_2, window_bounds = array<i64: 8, 512>}]} {
    %c0 = arith.constant 0 : index
    %c0_0 = arith.constant 0 : index
    %0 = vector.load %arg1[%c0, %c0_0] : memref<8x256xf32, #tpu.memory_space<vmem>>, vector<8x256xf32>
    %c0_1 = arith.constant 0 : index
    %c0_2 = arith.constant 0 : index
    %1 = vector.load %arg2[%c0_1, %c0_2] : memref<256x512xf32, #tpu.memory_space<vmem>>, vector<256x512xf32>
    %cst = arith.constant dense<0.000000e+00> : vector<8x512xf32>
    %2 = tpu.matmul %0, %1, %cst {dimension_numbers = #tpu.dot_dimension_numbers<[1], [0], [0], [1], [0, 0, 1, 1], [], []>} : vector<8x256xf32>, vector<256x512xf32>, vector<8x512xf32> -> vector<8x512xf32>
    %c0_3 = arith.constant 0 : index
    %c0_4 = arith.constant 0 : index
    %3 = vector.load %arg3[%c0_3, %c0_4] : memref<8x512xf32, #tpu.memory_space<vmem>>, vector<8x512xf32>
    tpu.vector_store %arg3[%c0_3, %c0_4], %2 {strides = array<i32>} : memref<8x512xf32, #tpu.memory_space<vmem>>, vector<8x512xf32>,
    return
  }
  func.func @transform_0(%arg0: i32) -> (i32, i32) {
    %c0_i32 = arith.constant 0 : i32
    %c0_i32_0 = arith.constant 0 : i32
    return %arg0, %c0_i32 : i32, i32
  }
  func.func @transform_1(%arg0: i32) -> (i32, i32) {
    %c0_i32 = arith.constant 0 : i32
    %c0_i32_0 = arith.constant 0 : i32
    %c0_i32_1 = arith.constant 0 : i32
    return %c0_i32, %c0_i32_0 : i32, i32
  }
  func.func @transform_2(%arg0: i32) -> (i32, i32) {
    %c0_i32 = arith.constant 0 : i32
    %c0_i32_0 = arith.constant 0 : i32
    return %arg0, %c0_i32 : i32, i32
  }
}

module attributes {stable_mosaic.version = 11 : i64} {
  func.func @_kron_resize_kernel(%arg0: i32, %arg1: memref<8x256xf32, #tpu.memory_space<vmem>>, %arg2: memref<256x512xf32, #tpu.memory_space<vmem>>, %arg3: memref<8x512xf32, #tpu.memory_space<vmem>>) attributes {dimension_semantics = [#tpu.dimension_semantics<parallel>], iteration_bounds = array<i64: 1>, scalar_prefetch = 0 : i64, scratch_operands = 0 : i64, tpu.core_type = #tpu.core_type<tc>, window_params = [{transform_indices = @transform_0, window_bounds = array<i64: 8, 256>}, {pipeline_mode = #tpu.pipeline_mode<synchronous>, transform_indices = @transform_1, window_bounds = array<i64: 256, 512>}, {transform_indices = @transform_2, window_bounds = array<i64: 8, 512>}]} {
    %c0 = arith.constant 0 : index
    %c0_0 = arith.constant 0 : index
    %0 = vector.load %arg1[%c0, %c0_0] : memref<8x256xf32, #tpu.memory_space<vmem>>, vector<8x256xf32>
    %c0_1 = arith.constant 0 : index
    %c0_2 = arith.constant 0 : index
    %1 = vector.load %arg2[%c0_1, %c0_2] : memref<256x512xf32, #tpu.memory_space<vmem>>, vector<256x512xf32>
    %cst = arith.constant dense<0.000000e+00> : vector<8x512xf32>
    %2 = tpu.matmul %0, %1, %cst {dimension_numbers = #tpu.dot_dimension_numbers<[1], [0], [0], [1], [0, 0, 1, 1], [], []>} : vector<8x256xf32>, vector<256x512xf32>, vector<8x512xf32> -> vector<8x512xf32>
    %c0_3 = arith.constant 0 : index
    %c0_4 = arith.constant 0 : index
    %3 = vector.load %arg3[%c0_3, %c0_4] : memref<8x512xf32, #tpu.memory_space<vmem>>, vector<8x512xf32>
    tpu.vector_store %arg3[%c0_3, %c0_4], %2 {strides = array<i32>} : memref<8x512xf32, #tpu.memory_space<vmem>>, vector<8x512xf32>,
    return
  }
  func.func @transform_0(%arg0: i32) -> (i32, i32) {
    %c0_i32 = arith.constant 0 : i32
    %c0_i32_0 = arith.constant 0 : i32
    return %arg0, %c0_i32 : i32, i32
  }
  func.func @transform_1(%arg0: i32) -> (i32, i32) {
    %c0_i32 = arith.constant 0 : i32
    %c0_i32_0 = arith.constant 0 : i32
    %c0_i32_1 = arith.constant 0 : i32
    return %c0_i32, %c0_i32_0 : i32, i32
  }
  func.func @transform_2(%arg0: i32) -> (i32, i32) {
    %c0_i32 = arith.constant 0 : i32
    %c0_i32_0 = arith.constant 0 : i32
    return %arg0, %c0_i32 : i32, i32
  }
}

</mosaic_0001>

<bundles_post_ra>
// kernel: tpu_custom_call.1
= control target key start
LH: loop header
LB: loop body
LE: loop exit
PB: predicated region body
PF: predicated region fallthrough
CT: control target
= control target key end

     0   :  { %7 = vsyncpa [#allocation3], 0  ;;  %s598_s0 = inlined_call_operand.hbm [shape: f32[8,256], index: 0, kind: input, shape index: {}]   ;;  %s599_s1 = inlined_call_operand.hbm [shape: f32[256,512], index: 1, kind: input, shape index: {}]   ;;  %s600_s2 = inlined_call_operand.hbm [shape: f32[8,512], index: 2, kind: output, shape index: {}]  }
   0x1   :  { %8 = vsyncpa [#allocation6], 0 }
   0x2   :  { %9 = vsyncpa [#allocation4], 0  ;;  %s535_s9 = smov [#allocation2]   ;;  %s536_s11 = smov [#allocation5]  }
   0x3   :  { %s16_s10 = sshll.u32 %s535_s9, 4  ;;  %s25_s12 = sshll.u32 %s536_s11, 4  ;;  %s17_s10 = int_to_ptr.vmem [resolvable:$true] %s16_s10  ;;  %s555_s12 = int_to_ptr.vmem [resolvable:$true] %s25_s12 }
   0x4   :  { %s463_s15 = scalar_lea.hbm %s598_s0, 256 }
   0x5   :  { %p464_p0 = scmp.ne.s32.totalorder %s598_s0, %s463_s15  ;;  %p467_p1 = scmp.lt.u32.totalorder %s463_s15, %s598_s0 }
   0x7   :  { %p469_p2 = pnand %p467_p1, %p464_p0 }
   0x9   :  { %472 = shalt.err (!%p469_p2)
}
   0xa   :  { %s473_s20 = scalar_lea.vmem %s17_s10, 256  ;;  %p478_p4 = scmp.lt.s32.totalorder %s17_s10, %s17_s10 }
   0xb   :  { %p474_p3 = scmp.ne.s32.totalorder %s17_s10, %s473_s20  ;;  %p479_p5 = scmp.lt.s32.totalorder %s473_s20, %s473_s20 }
   0xd   :  { %p480_p6 = por %p479_p5, %p478_p4 }
   0xf   :  { %p481_p7 = pnand %p480_p6, %p474_p3 }
  0x11   :  { %484 = shalt.err (!%p481_p7)
}
  0x12   :  { %19 = dma.hbm_to_vmem [thread:$0]  %s598_s0, 256, %s17_s10, [#allocation3]  }
  0x13   :  { %s485_s25 = scalar_lea.hbm %s599_s1, 16384 }
  0x14   :  { %p486_p8 = scmp.ne.s32.totalorder %s599_s1, %s485_s25  ;;  %p489_p9 = scmp.lt.u32.totalorder %s485_s25, %s599_s1 }
  0x16   :  { %p491_p10 = pnand %p489_p9, %p486_p8 }
  0x18   :  { %494 = shalt.err (!%p491_p10)
}
  0x19   :  { %s495_s30 = scalar_lea.vmem %s555_s12, 16384  ;;  %p500_p12 = scmp.lt.s32.totalorder %s555_s12, %s555_s12 }
  0x1a   :  { %p496_p11 = scmp.ne.s32.totalorder %s555_s12, %s495_s30  ;;  %p501_p13 = scmp.lt.s32.totalorder %s495_s30, %s495_s30 }
  0x1c   :  { %p502_p0 = por %p501_p13, %p500_p12 }
  0x1e   :  { %p503_p1 = pnand %p502_p0, %p496_p11 }
  0x20   :  { %506 = shalt.err (!%p503_p1)
}
  0x21   :  { %s537_s0 = smov 512   ;;  %s538_s3 = smov 32  }
  0x22   :  { %31 = dma.hbm_to_vmem [thread:$0]  %s599_s1, 16384, %s555_s12, [#allocation6], %s537_s0, %s537_s0, %s538_s3  }
  0x23   :  { %529 = dma.done.wait [#allocation3], 256  }
  0x24   :  { %530 = vsyncadd [#allocation3], 4294967040 }
  0x25   :  { %531 = dma.done.wait [#allocation6], 16384  }
  0x26   :  { %532 = vsyncadd [#allocation6], 4294950912  ;;  %v41_v0 = vld [vmem:[#allocation5 + $0x8] sm:$0xff]  ;;  %v43_v2 = vld [vmem:[#allocation5 + $0x18] sm:$0xff]  ;;  %s539_s1 = smov [#allocation7]  }
  0x27   :  { %v45_v1 = vld [vmem:[#allocation5 + $0x28] sm:$0xff]  ;;  %v47_v4 = vld [vmem:[#allocation5 + $0x38] sm:$0xff]  ;;  %v40_v5 = vld [vmem:[#allocation5] sm:$0xff]  ;;  %s320_s6 = sshll.u32 %s539_s1, 4  ;;  %s321_s6 = int_to_ptr.vmem [resolvable:$true] %s320_s6 }
  0x28   :  { %v330_v3 = vpack.c.bf16 %v45_v1, %v41_v0  ;;  %v44_v6 = vld [vmem:[#allocation5 + $0x20] sm:$0xff]  ;;  %v394_v7 = vpack.c.bf16 %v47_v4, %v43_v2  ;;  %v42_v9 = vld [vmem:[#allocation5 + $0x10] sm:$0xff]  ;;  %v49_v11 = vld [vmem:[#allocation5 + $0x48] sm:$0xff]  ;;  %s507_s7 = scalar_lea.vmem %s321_s6, 512  ;;  %p512_p3 = scmp.lt.s32.totalorder %s321_s6, %s321_s6 }
  0x29   :  { %v332_v8 = vpack.c.bf16 %v44_v6, %v40_v5  ;;  %v46_v10 = vld [vmem:[#allocation5 + $0x30] sm:$0xff]  ;;  %v53_v13 = vld [vmem:[#allocation5 + $0x68] sm:$0xff]  ;;  %v51_v14 = vld [vmem:[#allocation5 + $0x58] sm:$0xff]  ;;  %p508_p2 = scmp.ne.s32.totalorder %s321_s6, %s507_s7  ;;  %p513_p4 = scmp.lt.s32.totalorder %s507_s7, %s507_s7 }
  0x2a   :  { %331 = vmatprep.subr.bf16.mxu0 %v330_v3  ;;  %v396_v12 = vpack.c.bf16 %v46_v10, %v42_v9  ;;  %v55_v15 = vld [vmem:[#allocation5 + $0x78] sm:$0xff]  ;;  %395 = vmatprep.subr.bf16.mxu1 %v394_v7  ;;  %v334_v16 = vpack.c.bf16 %v53_v13, %v49_v11  ;;  %v48_v18 = vld [vmem:[#allocation5 + $0x40] sm:$0xff]  ;;  %v50_v20 = vld [vmem:[#allocation5 + $0x50] sm:$0xff] }
  0x2b   :  { %333 = vmatpush1.bf16.msra.mxu0 %v332_v8  ;;  %v398_v17 = vpack.c.bf16 %v55_v15, %v51_v14  ;;  %v52_v19 = vld [vmem:[#allocation5 + $0x60] sm:$0xff]  ;;  %v54_v22 = vld [vmem:[#allocation5 + $0x70] sm:$0xff]  ;;  %v57_v23 = vld [vmem:[#allocation5 + $0x88] sm:$0xff]  ;;  %p514_p5 = por %p513_p4, %p512_p3 }
  0x2c   :  { %397 = vmatpush1.bf16.msra.mxu1 %v396_v12  ;;  %v336_v21 = vpack.c.bf16 %v52_v19, %v48_v18  ;;  %v61_v24 = vld [vmem:[#allocation5 + $0xa8] sm:$0xff]  ;;  %335 = vmatprep.subr.bf16.mxu0 %v334_v16  ;;  %v400_v25 = vpack.c.bf16 %v54_v22, %v50_v20  ;;  %v59_v27 = vld [vmem:[#allocation5 + $0x98] sm:$0xff]  ;;  %v56_v29 = vld [vmem:[#allocation5 + $0x80] sm:$0xff] }
  0x2d   :  { %399 = vmatprep.subr.bf16.mxu1 %v398_v17  ;;  %v338_v26 = vpack.c.bf16 %v61_v24, %v57_v23  ;;  %v63_v28 = vld [vmem:[#allocation5 + $0xb8] sm:$0xff]  ;;  %v60_v31 = vld [vmem:[#allocation5 + $0xa0] sm:$0xff]  ;;  %v58_v32 = vld [vmem:[#allocation5 + $0x90] sm:$0xff]  ;;  %p515_p6 = pnand %p514_p5, %p508_p2 }
  0x2e   :  { %v402_v30 = vpack.c.bf16 %v63_v28, %v59_v27  ;;  %v62_v33 = vld [vmem:[#allocation5 + $0xb0] sm:$0xff]  ;;  %v340_v34 = vpack.c.bf16 %v60_v31, %v56_v29  ;;  %v65_v35 = vld [vmem:[#allocation5 + $0xc8] sm:$0xff]  ;;  %v67_v37 = vld [vmem:[#allocation5 + $0xd8] sm:$0xff] }
  0x2f   :  { %337 = vmatpush1.bf16.msra.mxu0 %v336_v21  ;;  %v69_v36 = vld [vmem:[#allocation5 + $0xe8] sm:$0xff]  ;;  %v404_v38 = vpack.c.bf16 %v62_v33, %v58_v32  ;;  %v71_v40 = vld [vmem:[#allocation5 + $0xf8] sm:$0xff]  ;;  %v64_v41 = vld [vmem:[#allocation5 + $0xc0] sm:$0xff] }
  0x30   :  { %401 = vmatpush1.bf16.msra.mxu1 %v400_v25  ;;  %339 = vmatprep.subr.bf16.mxu0 %v338_v26  ;;  %v342_v39 = vpack.c.bf16 %v69_v36, %v65_v35  ;;  %v68_v42 = vld [vmem:[#allocation5 + $0xe0] sm:$0xff]  ;;  %v406_v43 = vpack.c.bf16 %v71_v40, %v67_v37  ;;  %v66_v44 = vld [vmem:[#allocation5 + $0xd0] sm:$0xff]  ;;  %v73_v46 = vld [vmem:[#allocation5 + $0x108] sm:$0xff] }
  0x31   :  { %403 = vmatprep.subr.bf16.mxu1 %v402_v30  ;;  %v70_v45 = vld [vmem:[#allocation5 + $0xf0] sm:$0xff]  ;;  %v77_v47 = vld [vmem:[#allocation5 + $0x128] sm:$0xff]  ;;  %v75_v48 = vld [vmem:[#allocation5 + $0x118] sm:$0xff]  ;;  %v344_v50 = vpack.c.bf16 %v68_v42, %v64_v41 }
  0x32   :  { %v79_v49 = vld [vmem:[#allocation5 + $0x138] sm:$0xff]  ;;  %v408_v51 = vpack.c.bf16 %v70_v45, %v66_v44  ;;  %v346_v52 = vpack.c.bf16 %v77_v47, %v73_v46  ;;  %v72_v53 = vld [vmem:[#allocation5 + $0x100] sm:$0xff]  ;;  %v74_v55 = vld [vmem:[#allocation5 + $0x110] sm:$0xff] }
  0x33   :  { %341 = vmatpush1.bf16.msra.mxu0 %v340_v34  ;;  %v76_v54 = vld [vmem:[#allocation5 + $0x120] sm:$0xff]  ;;  %v410_v56 = vpack.c.bf16 %v79_v49, %v75_v48  ;;  %v78_v57 = vld [vmem:[#allocation5 + $0x130] sm:$0xff]  ;;  %v81_v58 = vld [vmem:[#allocation5 + $0x148] sm:$0xff] }
  0x34   :  { %405 = vmatpush1.bf16.msra.mxu1 %v404_v38  ;;  %343 = vmatprep.subr.bf16.mxu0 %v342_v39  ;;  %v85_v59 = vld [vmem:[#allocation5 + $0x168] sm:$0xff]  ;;  %v83_v60 = vld [vmem:[#allocation5 + $0x158] sm:$0xff]  ;;  %v348_v62 = vpack.c.bf16 %v76_v54, %v72_v53  ;;  %v412_v63 = vpack.c.bf16 %v78_v57, %v74_v55  ;;  %v80_v1 = vld [vmem:[#allocation5 + $0x140] sm:$0xff] }
  0x35   :  { %407 = vmatprep.subr.bf16.mxu1 %v406_v43  ;;  %v87_v61 = vld [vmem:[#allocation5 + $0x178] sm:$0xff]  ;;  %v350_v0 = vpack.c.bf16 %v85_v59, %v81_v58  ;;  %v84_v2 = vld [vmem:[#allocation5 + $0x160] sm:$0xff]  ;;  %v82_v3 = vld [vmem:[#allocation5 + $0x150] sm:$0xff] }
  0x36   :  { %v414_v4 = vpack.c.bf16 %v87_v61, %v83_v60  ;;  %v86_v5 = vld [vmem:[#allocation5 + $0x170] sm:$0xff]  ;;  %v89_v6 = vld [vmem:[#allocation5 + $0x188] sm:$0xff]  ;;  %v91_v8 = vld [vmem:[#allocation5 + $0x198] sm:$0xff]  ;;  %v352_v10 = vpack.c.bf16 %v84_v2, %v80_v1 }
  0x37   :  { %345 = vmatpush1.bf16.msra.mxu0 %v344_v50  ;;  %v93_v7 = vld [vmem:[#allocation5 + $0x1a8] sm:$0xff]  ;;  %v95_v9 = vld [vmem:[#allocation5 + $0x1b8] sm:$0xff]  ;;  %v416_v11 = vpack.c.bf16 %v86_v5, %v82_v3  ;;  %v88_v13 = vld [vmem:[#allocation5 + $0x180] sm:$0xff] }
  0x38   :  { %409 = vmatpush1.bf16.msra.mxu1 %v408_v51  ;;  %347 = vmatprep.subr.bf16.mxu0 %v346_v52  ;;  %v354_v12 = vpack.c.bf16 %v93_v7, %v89_v6  ;;  %v92_v14 = vld [vmem:[#allocation5 + $0x1a0] sm:$0xff]  ;;  %v90_v15 = vld [vmem:[#allocation5 + $0x190] sm:$0xff]  ;;  %v418_v16 = vpack.c.bf16 %v95_v9, %v91_v8  ;;  %v97_v18 = vld [vmem:[#allocation5 + $0x1c8] sm:$0xff] }
  0x39   :  { %411 = vmatprep.subr.bf16.mxu1 %v410_v56  ;;  %v94_v17 = vld [vmem:[#allocation5 + $0x1b0] sm:$0xff]  ;;  %v101_v19 = vld [vmem:[#allocation5 + $0x1e8] sm:$0xff]  ;;  %v99_v20 = vld [vmem:[#allocation5 + $0x1d8] sm:$0xff]  ;;  %v356_v22 = vpack.c.bf16 %v92_v14, %v88_v13 }
  0x3a   :  { %v103_v21 = vld [vmem:[#allocation5 + $0x1f8] sm:$0xff]  ;;  %v420_v23 = vpack.c.bf16 %v94_v17, %v90_v15  ;;  %v358_v24 = vpack.c.bf16 %v101_v19, %v97_v18  ;;  %v96_v25 = vld [vmem:[#allocation5 + $0x1c0] sm:$0xff]  ;;  %v98_v27 = vld [vmem:[#allocation5 + $0x1d0] sm:$0xff] }
  0x3b   :  { %349 = vmatpush1.bf16.msra.mxu0 %v348_v62  ;;  %v100_v26 = vld [vmem:[#allocation5 + $0x1e0] sm:$0xff]  ;;  %v422_v28 = vpack.c.bf16 %v103_v21, %v99_v20  ;;  %v102_v29 = vld [vmem:[#allocation5 + $0x1f0] sm:$0xff]  ;;  %v105_v30 = vld [vmem:[#allocation5 + $0x208] sm:$0xff] }
  0x3c   :  { %413 = vmatpush1.bf16.msra.mxu1 %v412_v63  ;;  %351 = vmatprep.subr.bf16.mxu0 %v350_v0  ;;  %v109_v31 = vld [vmem:[#allocation5 + $0x228] sm:$0xff]  ;;  %v107_v32 = vld [vmem:[#allocation5 + $0x218] sm:$0xff]  ;;  %v360_v34 = vpack.c.bf16 %v100_v26, %v96_v25  ;;  %v424_v35 = vpack.c.bf16 %v102_v29, %v98_v27  ;;  %v104_v37 = vld [vmem:[#allocation5 + $0x200] sm:$0xff] }
  0x3d   :  { %415 = vmatprep.subr.bf16.mxu1 %v414_v4  ;;  %v111_v33 = vld [vmem:[#allocation5 + $0x238] sm:$0xff]  ;;  %v362_v36 = vpack.c.bf16 %v109_v31, %v105_v30  ;;  %v108_v38 = vld [vmem:[#allocation5 + $0x220] sm:$0xff]  ;;  %v106_v39 = vld [vmem:[#allocation5 + $0x210] sm:$0xff] }
  0x3e   :  { %v426_v40 = vpack.c.bf16 %v111_v33, %v107_v32  ;;  %v110_v41 = vld [vmem:[#allocation5 + $0x230] sm:$0xff]  ;;  %v113_v42 = vld [vmem:[#allocation5 + $0x248] sm:$0xff]  ;;  %v115_v44 = vld [vmem:[#allocation5 + $0x258] sm:$0xff]  ;;  %v364_v46 = vpack.c.bf16 %v108_v38, %v104_v37 }
  0x3f   :  { %353 = vmatpush1.bf16.msra.mxu0 %v352_v10  ;;  %v117_v43 = vld [vmem:[#allocation5 + $0x268] sm:$0xff]  ;;  %v119_v45 = vld [vmem:[#allocation5 + $0x278] sm:$0xff]  ;;  %v428_v47 = vpack.c.bf16 %v110_v41, %v106_v39  ;;  %v112_v49 = vld [vmem:[#allocation5 + $0x240] sm:$0xff] }
  0x40   :  { %417 = vmatpush1.bf16.msra.mxu1 %v416_v11  ;;  %355 = vmatprep.subr.bf16.mxu0 %v354_v12  ;;  %v366_v48 = vpack.c.bf16 %v117_v43, %v113_v42  ;;  %v116_v50 = vld [vmem:[#allocation5 + $0x260] sm:$0xff]  ;;  %v114_v51 = vld [vmem:[#allocation5 + $0x250] sm:$0xff]  ;;  %v430_v52 = vpack.c.bf16 %v119_v45, %v115_v44  ;;  %v121_v54 = vld [vmem:[#allocation5 + $0x288] sm:$0xff] }
  0x41   :  { %419 = vmatprep.subr.bf16.mxu1 %v418_v16  ;;  %v118_v53 = vld [vmem:[#allocation5 + $0x270] sm:$0xff]  ;;  %v125_v55 = vld [vmem:[#allocation5 + $0x2a8] sm:$0xff]  ;;  %v123_v56 = vld [vmem:[#allocation5 + $0x298] sm:$0xff]  ;;  %v368_v58 = vpack.c.bf16 %v116_v50, %v112_v49 }
  0x42   :  { %v127_v57 = vld [vmem:[#allocation5 + $0x2b8] sm:$0xff]  ;;  %v432_v59 = vpack.c.bf16 %v118_v53, %v114_v51  ;;  %v370_v60 = vpack.c.bf16 %v125_v55, %v121_v54  ;;  %v120_v61 = vld [vmem:[#allocation5 + $0x280] sm:$0xff]  ;;  %v122_v63 = vld [vmem:[#allocation5 + $0x290] sm:$0xff] }
  0x43   :  { %357 = vmatpush1.bf16.msra.mxu0 %v356_v22  ;;  %v124_v62 = vld [vmem:[#allocation5 + $0x2a0] sm:$0xff]  ;;  %v434_v0 = vpack.c.bf16 %v127_v57, %v123_v56  ;;  %v126_v1 = vld [vmem:[#allocation5 + $0x2b0] sm:$0xff]  ;;  %v129_v2 = vld [vmem:[#allocation5 + $0x2c8] sm:$0xff] }
  0x44   :  { %421 = vmatpush1.bf16.msra.mxu1 %v420_v23  ;;  %359 = vmatprep.subr.bf16.mxu0 %v358_v24  ;;  %v133_v3 = vld [vmem:[#allocation5 + $0x2e8] sm:$0xff]  ;;  %v131_v4 = vld [vmem:[#allocation5 + $0x2d8] sm:$0xff]  ;;  %v372_v6 = vpack.c.bf16 %v124_v62, %v120_v61  ;;  %v128_v7 = vld [vmem:[#allocation5 + $0x2c0] sm:$0xff]  ;;  %v436_v8 = vpack.c.bf16 %v126_v1, %v122_v63 }
  0x45   :  { %423 = vmatprep.subr.bf16.mxu1 %v422_v28  ;;  %v135_v5 = vld [vmem:[#allocation5 + $0x2f8] sm:$0xff]  ;;  %v374_v9 = vpack.c.bf16 %v133_v3, %v129_v2  ;;  %v132_v10 = vld [vmem:[#allocation5 + $0x2e0] sm:$0xff]  ;;  %v130_v11 = vld [vmem:[#allocation5 + $0x2d0] sm:$0xff] }
  0x46   :  { %v134_v12 = vld [vmem:[#allocation5 + $0x2f0] sm:$0xff]  ;;  %v438_v13 = vpack.c.bf16 %v135_v5, %v131_v4  ;;  %v137_v14 = vld [vmem:[#allocation5 + $0x308] sm:$0xff]  ;;  %v39_v16 = vld [vmem:[#allocation2 + $0x8] sm:$0xff]  ;;  %v376_v19 = vpack.c.bf16 %v132_v10, %v128_v7 }
  0x47   :  { %361 = vmatpush1.bf16.msra.mxu0 %v360_v34  ;;  %v141_v15 = vld [vmem:[#allocation5 + $0x328] sm:$0xff]  ;;  %v139_v17 = vld [vmem:[#allocation5 + $0x318] sm:$0xff]  ;;  %232 = vmatprep.mubr.f32.mxu0 %v39_v16  ;;  %v440_v20 = vpack.c.bf16 %v134_v12, %v130_v11  ;;  %v136_v22 = vld [vmem:[#allocation5 + $0x300] sm:$0xff] }
  0x48   :  { %425 = vmatpush1.bf16.msra.mxu1 %v424_v35  ;;  %363 = vmatprep.subr.bf16.mxu0 %v362_v36  ;;  %v143_v18 = vld [vmem:[#allocation5 + $0x338] sm:$0xff]  ;;  %v378_v21 = vpack.c.bf16 %v141_v15, %v137_v14  ;;  %v140_v23 = vld [vmem:[#allocation5 + $0x320] sm:$0xff]  ;;  %v138_v24 = vld [vmem:[#allocation5 + $0x310] sm:$0xff] }
  0x49   :  { %427 = vmatprep.subr.bf16.mxu1 %v426_v40  ;;  %303 = vmatprep.mubr.f32.mxu1 %v39_v16  ;;  %v442_v25 = vpack.c.bf16 %v143_v18, %v139_v17  ;;  %v142_v26 = vld [vmem:[#allocation5 + $0x330] sm:$0xff]  ;;  %v145_v27 = vld [vmem:[#allocation5 + $0x348] sm:$0xff]  ;;  %v147_v29 = vld [vmem:[#allocation5 + $0x358] sm:$0xff]  ;;  %v380_v31 = vpack.c.bf16 %v140_v23, %v136_v22 }
  0x4a   :  { %v149_v28 = vld [vmem:[#allocation5 + $0x368] sm:$0xff]  ;;  %v151_v30 = vld [vmem:[#allocation5 + $0x378] sm:$0xff]  ;;  %v444_v32 = vpack.c.bf16 %v142_v26, %v138_v24  ;;  %v144_v34 = vld [vmem:[#allocation5 + $0x340] sm:$0xff] }
  0x4b   :  { %365 = vmatpush1.bf16.msra.mxu0 %v364_v46  ;;  %v382_v33 = vpack.c.bf16 %v149_v28, %v145_v27  ;;  %v148_v35 = vld [vmem:[#allocation5 + $0x360] sm:$0xff]  ;;  %v146_v36 = vld [vmem:[#allocation5 + $0x350] sm:$0xff]  ;;  %v446_v37 = vpack.c.bf16 %v151_v30, %v147_v29  ;;  %v153_v39 = vld [vmem:[#allocation5 + $0x388] sm:$0xff] }
  0x4c   :  { %429 = vmatpush1.bf16.msra.mxu1 %v428_v47  ;;  %367 = vmatprep.subr.bf16.mxu0 %v366_v48  ;;  %v150_v38 = vld [vmem:[#allocation5 + $0x370] sm:$0xff]  ;;  %v157_v40 = vld [vmem:[#allocation5 + $0x3a8] sm:$0xff]  ;;  %v155_v41 = vld [vmem:[#allocation5 + $0x398] sm:$0xff]  ;;  %v384_v43 = vpack.c.bf16 %v148_v35, %v144_v34 }
  0x4d   :  { %431 = vmatprep.subr.bf16.mxu1 %v430_v52  ;;  %v159_v42 = vld [vmem:[#allocation5 + $0x3b8] sm:$0xff]  ;;  %v448_v44 = vpack.c.bf16 %v150_v38, %v146_v36  ;;  %v386_v45 = vpack.c.bf16 %v157_v40, %v153_v39  ;;  %v152_v46 = vld [vmem:[#allocation5 + $0x380] sm:$0xff]  ;;  %v154_v48 = vld [vmem:[#allocation5 + $0x390] sm:$0xff] }
  0x4e   :  { %v156_v47 = vld [vmem:[#allocation5 + $0x3a0] sm:$0xff]  ;;  %v450_v49 = vpack.c.bf16 %v159_v42, %v155_v41  ;;  %v158_v50 = vld [vmem:[#allocation5 + $0x3b0] sm:$0xff]  ;;  %v161_v51 = vld [vmem:[#allocation5 + $0x3c8] sm:$0xff] }
  0x4f   :  { %369 = vmatpush1.bf16.msra.mxu0 %v368_v58  ;;  %v165_v52 = vld [vmem:[#allocation5 + $0x3e8] sm:$0xff]  ;;  %v163_v53 = vld [vmem:[#allocation5 + $0x3d8] sm:$0xff]  ;;  %v388_v55 = vpack.c.bf16 %v156_v47, %v152_v46  ;;  %v452_v56 = vpack.c.bf16 %v158_v50, %v154_v48  ;;  %v160_v58 = vld [vmem:[#allocation5 + $0x3c0] sm:$0xff] }
  0x50   :  { %433 = vmatpush1.bf16.msra.mxu1 %v432_v59  ;;  %371 = vmatprep.subr.bf16.mxu0 %v370_v60  ;;  %v167_v54 = vld [vmem:[#allocation5 + $0x3f8] sm:$0xff]  ;;  %v390_v57 = vpack.c.bf16 %v165_v52, %v161_v51  ;;  %v164_v59 = vld [vmem:[#allocation5 + $0x3e0] sm:$0xff]  ;;  %v162_v61 = vld [vmem:[#allocation5 + $0x3d0] sm:$0xff] }
  0x51   :  { %435 = vmatprep.subr.bf16.mxu1 %v434_v0  ;;  %v454_v60 = vpack.c.bf16 %v167_v54, %v163_v53  ;;  %v166_v62 = vld [vmem:[#allocation5 + $0x3f0] sm:$0xff]  ;;  %v392_v63 = vpack.c.bf16 %v164_v59, %v160_v58 }
  0x52   :  { %v456_v0 = vpack.c.bf16 %v166_v62, %v162_v61  ;;  %v38_v1 = vld [vmem:[#allocation2] sm:$0xff] }
  0x53   :  { %373 = vmatpush1.bf16.msra.mxu0 %v372_v6 }
  0x54   :  { %437 = vmatpush1.bf16.msra.mxu1 %v436_v8  ;;  %375 = vmatprep.subr.bf16.mxu0 %v374_v9 }
  0x55   :  { %439 = vmatprep.subr.bf16.mxu1 %v438_v13 }
  0x57   :  { %377 = vmatpush1.bf16.msra.mxu0 %v376_v19 }
  0x58   :  { %441 = vmatpush1.bf16.msra.mxu1 %v440_v20  ;;  %379 = vmatprep.subr.bf16.mxu0 %v378_v21 }
  0x59   :  { %443 = vmatprep.subr.bf16.mxu1 %v442_v25 }
  0x5b   :  { %381 = vmatpush1.bf16.msra.mxu0 %v380_v31 }
  0x5c   :  { %445 = vmatpush1.bf16.msra.mxu1 %v444_v32  ;;  %383 = vmatprep.subr.bf16.mxu0 %v382_v33 }
  0x5d   :  { %447 = vmatprep.subr.bf16.mxu1 %v446_v37 }
  0x5f   :  { %385 = vmatpush1.bf16.msra.mxu0 %v384_v43 }
  0x60   :  { %449 = vmatpush1.bf16.msra.mxu1 %v448_v44  ;;  %387 = vmatprep.subr.bf16.mxu0 %v386_v45 }
  0x61   :  { %451 = vmatprep.subr.bf16.mxu1 %v450_v49 }
  0x63   :  { %389 = vmatpush1.bf16.msra.mxu0 %v388_v55 }
  0x64   :  { %453 = vmatpush1.bf16.msra.mxu1 %v452_v56  ;;  %391 = vmatprep.subr.bf16.mxu0 %v390_v57 }
  0x65   :  { %455 = vmatprep.subr.bf16.mxu1 %v454_v60 }
  0x67   :  { %393 = vmatpush1.bf16.msra.mxu0 %v392_v63 }
  0x68   :  { %457 = vmatpush1.bf16.msra.mxu1 %v456_v0 }
  0x6a   :  { %233 = vmatmul.mubr.f32.vlgmr.msra.gmra.mrb[0].mxu0 %v38_v1 }
  0x6b   :  { %304 = vmatmul.mubr.f32.vlgmr.msra.gmra.mrb[0].mxu1 %v38_v1 }
 0x13d   :  { %v234_v2 = vpop.f32.mrb[0].mxu0 }
 0x13e   :  { %310 = vst [vmem:[#allocation7] sm:$0xff] %v234_v2  ;;  %v305_v3 = vpop.f32.mrb[0].mxu1  ;;  %v236_v4 = vpop.f32.mrb[1].mxu0 }
 0x13f   :  { %312 = vst [vmem:[#allocation7 + $0x10] sm:$0xff] %v305_v3  ;;  %311 = vst [vmem:[#allocation7 + $0x8] sm:$0xff] %v236_v4  ;;  %v307_v5 = vpop.f32.mrb[1].mxu1 }
 0x140   :  { %313 = vst [vmem:[#allocation7 + $0x18] sm:$0xff] %v307_v5 }
 0x141   :  { %518 = shalt.err (!%p515_p6)
}
 0x142   :  { %s519_s10 = scalar_lea.hbm %s600_s2, 512 }
 0x143   :  { %p520_p7 = scmp.ne.s32.totalorder %s600_s2, %s519_s10  ;;  %p523_p8 = scmp.lt.u32.totalorder %s519_s10, %s600_s2 }
 0x145   :  { %p525_p9 = pnand %p523_p8, %p520_p7 }
 0x147   :  { %528 = shalt.err (!%p525_p9)
}
 0x148   :  { %323 = dma.vmem_to_hbm [thread:$0]  %s321_s6, 512, %s600_s2, [#allocation4]  }
 0x149   :  { %533 = dma.done.wait [#allocation4], 512  }
 0x14a   :  { %534 = vsyncadd [#allocation4], 4294966784 }
 0x14b   :  { %327 = vsyncpa [#allocation3], 1 }
 0x14c   :  { %328 = vsyncpa [#allocation6], 1 }
 0x14d   :  { %329 = vsyncpa [#allocation4], 1 }

// kernel: tpu_custom_call.1
= control target key start
LH: loop header
LB: loop body
LE: loop exit
PB: predicated region body
PF: predicated region fallthrough
CT: control target
= control target key end

     0   :  { %7 = vsyncpa [#allocation3], 0  ;;  %s598_s0 = inlined_call_operand.hbm [shape: f32[8,256], index: 0, kind: input, shape index: {}]   ;;  %s599_s1 = inlined_call_operand.hbm [shape: f32[256,512], index: 1, kind: input, shape index: {}]   ;;  %s600_s2 = inlined_call_operand.hbm [shape: f32[8,512], index: 2, kind: output, shape index: {}]  }
   0x1   :  { %8 = vsyncpa [#allocation6], 0 }
   0x2   :  { %9 = vsyncpa [#allocation4], 0  ;;  %s535_s9 = smov [#allocation2]   ;;  %s536_s11 = smov [#allocation5]  }
   0x3   :  { %s16_s10 = sshll.u32 %s535_s9, 4  ;;  %s25_s12 = sshll.u32 %s536_s11, 4  ;;  %s17_s10 = int_to_ptr.vmem [resolvable:$true] %s16_s10  ;;  %s555_s12 = int_to_ptr.vmem [resolvable:$true] %s25_s12 }
   0x4   :  { %s463_s15 = scalar_lea.hbm %s598_s0, 256 }
   0x5   :  { %p464_p0 = scmp.ne.s32.totalorder %s598_s0, %s463_s15  ;;  %p467_p1 = scmp.lt.u32.totalorder %s463_s15, %s598_s0 }
   0x7   :  { %p469_p2 = pnand %p467_p1, %p464_p0 }
   0x9   :  { %472 = shalt.err (!%p469_p2)
}
   0xa   :  { %s473_s20 = scalar_lea.vmem %s17_s10, 256  ;;  %p478_p4 = scmp.lt.s32.totalorder %s17_s10, %s17_s10 }
   0xb   :  { %p474_p3 = scmp.ne.s32.totalorder %s17_s10, %s473_s20  ;;  %p479_p5 = scmp.lt.s32.totalorder %s473_s20, %s473_s20 }
   0xd   :  { %p480_p6 = por %p479_p5, %p478_p4 }
   0xf   :  { %p481_p7 = pnand %p480_p6, %p474_p3 }
  0x11   :  { %484 = shalt.err (!%p481_p7)
}
  0x12   :  { %19 = dma.hbm_to_vmem [thread:$0]  %s598_s0, 256, %s17_s10, [#allocation3]  }
  0x13   :  { %s485_s25 = scalar_lea.hbm %s599_s1, 16384 }
  0x14   :  { %p486_p8 = scmp.ne.s32.totalorder %s599_s1, %s485_s25  ;;  %p489_p9 = scmp.lt.u32.totalorder %s485_s25, %s599_s1 }
  0x16   :  { %p491_p10 = pnand %p489_p9, %p486_p8 }
  0x18   :  { %494 = shalt.err (!%p491_p10)
}
  0x19   :  { %s495_s30 = scalar_lea.vmem %s555_s12, 16384  ;;  %p500_p12 = scmp.lt.s32.totalorder %s555_s12, %s555_s12 }
  0x1a   :  { %p496_p11 = scmp.ne.s32.totalorder %s555_s12, %s495_s30  ;;  %p501_p13 = scmp.lt.s32.totalorder %s495_s30, %s495_s30 }
  0x1c   :  { %p502_p0 = por %p501_p13, %p500_p12 }
  0x1e   :  { %p503_p1 = pnand %p502_p0, %p496_p11 }
  0x20   :  { %506 = shalt.err (!%p503_p1)
}
  0x21   :  { %s537_s0 = smov 512   ;;  %s538_s3 = smov 32  }
  0x22   :  { %31 = dma.hbm_to_vmem [thread:$0]  %s599_s1, 16384, %s555_s12, [#allocation6], %s537_s0, %s537_s0, %s538_s3  }
  0x23   :  { %529 = dma.done.wait [#allocation3], 256  }
  0x24   :  { %530 = vsyncadd [#allocation3], 4294967040 }
  0x25   :  { %531 = dma.done.wait [#allocation6], 16384  }
  0x26   :  { %532 = vsyncadd [#allocation6], 4294950912  ;;  %v41_v0 = vld [vmem:[#allocation5 + $0x8] sm:$0xff]  ;;  %v43_v2 = vld [vmem:[#allocation5 + $0x18] sm:$0xff]  ;;  %s539_s1 = smov [#allocation7]  }
  0x27   :  { %v45_v1 = vld [vmem:[#allocation5 + $0x28] sm:$0xff]  ;;  %v47_v4 = vld [vmem:[#allocation5 + $0x38] sm:$0xff]  ;;  %v40_v5 = vld [vmem:[#allocation5] sm:$0xff]  ;;  %s320_s6 = sshll.u32 %s539_s1, 4  ;;  %s321_s6 = int_to_ptr.vmem [resolvable:$true] %s320_s6 }
  0x28   :  { %v330_v3 = vpack.c.bf16 %v45_v1, %v41_v0  ;;  %v44_v6 = vld [vmem:[#allocation5 + $0x20] sm:$0xff]  ;;  %v394_v7 = vpack.c.bf16 %v47_v4, %v43_v2  ;;  %v42_v9 = vld [vmem:[#allocation5 + $0x10] sm:$0xff]  ;;  %v49_v11 = vld [vmem:[#allocation5 + $0x48] sm:$0xff]  ;;  %s507_s7 = scalar_lea.vmem %s321_s6, 512  ;;  %p512_p3 = scmp.lt.s32.totalorder %s321_s6, %s321_s6 }
  0x29   :  { %v332_v8 = vpack.c.bf16 %v44_v6, %v40_v5  ;;  %v46_v10 = vld [vmem:[#allocation5 + $0x30] sm:$0xff]  ;;  %v53_v13 = vld [vmem:[#allocation5 + $0x68] sm:$0xff]  ;;  %v51_v14 = vld [vmem:[#allocation5 + $0x58] sm:$0xff]  ;;  %p508_p2 = scmp.ne.s32.totalorder %s321_s6, %s507_s7  ;;  %p513_p4 = scmp.lt.s32.totalorder %s507_s7, %s507_s7 }
  0x2a   :  { %331 = vmatprep.subr.bf16.mxu0 %v330_v3  ;;  %v396_v12 = vpack.c.bf16 %v46_v10, %v42_v9  ;;  %v55_v15 = vld [vmem:[#allocation5 + $0x78] sm:$0xff]  ;;  %395 = vmatprep.subr.bf16.mxu1 %v394_v7  ;;  %v334_v16 = vpack.c.bf16 %v53_v13, %v49_v11  ;;  %v48_v18 = vld [vmem:[#allocation5 + $0x40] sm:$0xff]  ;;  %v50_v20 = vld [vmem:[#allocation5 + $0x50] sm:$0xff] }
  0x2b   :  { %333 = vmatpush1.bf16.msra.mxu0 %v332_v8  ;;  %v398_v17 = vpack.c.bf16 %v55_v15, %v51_v14  ;;  %v52_v19 = vld [vmem:[#allocation5 + $0x60] sm:$0xff]  ;;  %v54_v22 = vld [vmem:[#allocation5 + $0x70] sm:$0xff]  ;;  %v57_v23 = vld [vmem:[#allocation5 + $0x88] sm:$0xff]  ;;  %p514_p5 = por %p513_p4, %p512_p3 }
  0x2c   :  { %397 = vmatpush1.bf16.msra.mxu1 %v396_v12  ;;  %v336_v21 = vpack.c.bf16 %v52_v19, %v48_v18  ;;  %v61_v24 = vld [vmem:[#allocation5 + $0xa8] sm:$0xff]  ;;  %335 = vmatprep.subr.bf16.mxu0 %v334_v16  ;;  %v400_v25 = vpack.c.bf16 %v54_v22, %v50_v20  ;;  %v59_v27 = vld [vmem:[#allocation5 + $0x98] sm:$0xff]  ;;  %v56_v29 = vld [vmem:[#allocation5 + $0x80] sm:$0xff] }
  0x2d   :  { %399 = vmatprep.subr.bf16.mxu1 %v398_v17  ;;  %v338_v26 = vpack.c.bf16 %v61_v24, %v57_v23  ;;  %v63_v28 = vld [vmem:[#allocation5 + $0xb8] sm:$0xff]  ;;  %v60_v31 = vld [vmem:[#allocation5 + $0xa0] sm:$0xff]  ;;  %v58_v32 = vld [vmem:[#allocation5 + $0x90] sm:$0xff]  ;;  %p515_p6 = pnand %p514_p5, %p508_p2 }
  0x2e   :  { %v402_v30 = vpack.c.bf16 %v63_v28, %v59_v27  ;;  %v62_v33 = vld [vmem:[#allocation5 + $0xb0] sm:$0xff]  ;;  %v340_v34 = vpack.c.bf16 %v60_v31, %v56_v29  ;;  %v65_v35 = vld [vmem:[#allocation5 + $0xc8] sm:$0xff]  ;;  %v67_v37 = vld [vmem:[#allocation5 + $0xd8] sm:$0xff] }
  0x2f   :  { %337 = vmatpush1.bf16.msra.mxu0 %v336_v21  ;;  %v69_v36 = vld [vmem:[#allocation5 + $0xe8] sm:$0xff]  ;;  %v404_v38 = vpack.c.bf16 %v62_v33, %v58_v32  ;;  %v71_v40 = vld [vmem:[#allocation5 + $0xf8] sm:$0xff]  ;;  %v64_v41 = vld [vmem:[#allocation5 + $0xc0] sm:$0xff] }
  0x30   :  { %401 = vmatpush1.bf16.msra.mxu1 %v400_v25  ;;  %339 = vmatprep.subr.bf16.mxu0 %v338_v26  ;;  %v342_v39 = vpack.c.bf16 %v69_v36, %v65_v35  ;;  %v68_v42 = vld [vmem:[#allocation5 + $0xe0] sm:$0xff]  ;;  %v406_v43 = vpack.c.bf16 %v71_v40, %v67_v37  ;;  %v66_v44 = vld [vmem:[#allocation5 + $0xd0] sm:$0xff]  ;;  %v73_v46 = vld [vmem:[#allocation5 + $0x108] sm:$0xff] }
  0x31   :  { %403 = vmatprep.subr.bf16.mxu1 %v402_v30  ;;  %v70_v45 = vld [vmem:[#allocation5 + $0xf0] sm:$0xff]  ;;  %v77_v47 = vld [vmem:[#allocation5 + $0x128] sm:$0xff]  ;;  %v75_v48 = vld [vmem:[#allocation5 + $0x118] sm:$0xff]  ;;  %v344_v50 = vpack.c.bf16 %v68_v42, %v64_v41 }
  0x32   :  { %v79_v49 = vld [vmem:[#allocation5 + $0x138] sm:$0xff]  ;;  %v408_v51 = vpack.c.bf16 %v70_v45, %v66_v44  ;;  %v346_v52 = vpack.c.bf16 %v77_v47, %v73_v46  ;;  %v72_v53 = vld [vmem:[#allocation5 + $0x100] sm:$0xff]  ;;  %v74_v55 = vld [vmem:[#allocation5 + $0x110] sm:$0xff] }
  0x33   :  { %341 = vmatpush1.bf16.msra.mxu0 %v340_v34  ;;  %v76_v54 = vld [vmem:[#allocation5 + $0x120] sm:$0xff]  ;;  %v410_v56 = vpack.c.bf16 %v79_v49, %v75_v48  ;;  %v78_v57 = vld [vmem:[#allocation5 + $0x130] sm:$0xff]  ;;  %v81_v58 = vld [vmem:[#allocation5 + $0x148] sm:$0xff] }
  0x34   :  { %405 = vmatpush1.bf16.msra.mxu1 %v404_v38  ;;  %343 = vmatprep.subr.bf16.mxu0 %v342_v39  ;;  %v85_v59 = vld [vmem:[#allocation5 + $0x168] sm:$0xff]  ;;  %v83_v60 = vld [vmem:[#allocation5 + $0x158] sm:$0xff]  ;;  %v348_v62 = vpack.c.bf16 %v76_v54, %v72_v53  ;;  %v412_v63 = vpack.c.bf16 %v78_v57, %v74_v55  ;;  %v80_v1 = vld [vmem:[#allocation5 + $0x140] sm:$0xff] }
  0x35   :  { %407 = vmatprep.subr.bf16.mxu1 %v406_v43  ;;  %v87_v61 = vld [vmem:[#allocation5 + $0x178] sm:$0xff]  ;;  %v350_v0 = vpack.c.bf16 %v85_v59, %v81_v58  ;;  %v84_v2 = vld [vmem:[#allocation5 + $0x160] sm:$0xff]  ;;  %v82_v3 = vld [vmem:[#allocation5 + $0x150] sm:$0xff] }
  0x36   :  { %v414_v4 = vpack.c.bf16 %v87_v61, %v83_v60  ;;  %v86_v5 = vld [vmem:[#allocation5 + $0x170] sm:$0xff]  ;;  %v89_v6 = vld [vmem:[#allocation5 + $0x188] sm:$0xff]  ;;  %v91_v8 = vld [vmem:[#allocation5 + $0x198] sm:$0xff]  ;;  %v352_v10 = vpack.c.bf16 %v84_v2, %v80_v1 }
  0x37   :  { %345 = vmatpush1.bf16.msra.mxu0 %v344_v50  ;;  %v93_v7 = vld [vmem:[#allocation5 + $0x1a8] sm:$0xff]  ;;  %v95_v9 = vld [vmem:[#allocation5 + $0x1b8] sm:$0xff]  ;;  %v416_v11 = vpack.c.bf16 %v86_v5, %v82_v3  ;;  %v88_v13 = vld [vmem:[#allocation5 + $0x180] sm:$0xff] }
  0x38   :  { %409 = vmatpush1.bf16.msra.mxu1 %v408_v51  ;;  %347 = vmatprep.subr.bf16.mxu0 %v346_v52  ;;  %v354_v12 = vpack.c.bf16 %v93_v7, %v89_v6  ;;  %v92_v14 = vld [vmem:[#allocation5 + $0x1a0] sm:$0xff]  ;;  %v90_v15 = vld [vmem:[#allocation5 + $0x190] sm:$0xff]  ;;  %v418_v16 = vpack.c.bf16 %v95_v9, %v91_v8  ;;  %v97_v18 = vld [vmem:[#allocation5 + $0x1c8] sm:$0xff] }
  0x39   :  { %411 = vmatprep.subr.bf16.mxu1 %v410_v56  ;;  %v94_v17 = vld [vmem:[#allocation5 + $0x1b0] sm:$0xff]  ;;  %v101_v19 = vld [vmem:[#allocation5 + $0x1e8] sm:$0xff]  ;;  %v99_v20 = vld [vmem:[#allocation5 + $0x1d8] sm:$0xff]  ;;  %v356_v22 = vpack.c.bf16 %v92_v14, %v88_v13 }
  0x3a   :  { %v103_v21 = vld [vmem:[#allocation5 + $0x1f8] sm:$0xff]  ;;  %v420_v23 = vpack.c.bf16 %v94_v17, %v90_v15  ;;  %v358_v24 = vpack.c.bf16 %v101_v19, %v97_v18  ;;  %v96_v25 = vld [vmem:[#allocation5 + $0x1c0] sm:$0xff]  ;;  %v98_v27 = vld [vmem:[#allocation5 + $0x1d0] sm:$0xff] }
  0x3b   :  { %349 = vmatpush1.bf16.msra.mxu0 %v348_v62  ;;  %v100_v26 = vld [vmem:[#allocation5 + $0x1e0] sm:$0xff]  ;;  %v422_v28 = vpack.c.bf16 %v103_v21, %v99_v20  ;;  %v102_v29 = vld [vmem:[#allocation5 + $0x1f0] sm:$0xff]  ;;  %v105_v30 = vld [vmem:[#allocation5 + $0x208] sm:$0xff] }
  0x3c   :  { %413 = vmatpush1.bf16.msra.mxu1 %v412_v63  ;;  %351 = vmatprep.subr.bf16.mxu0 %v350_v0  ;;  %v109_v31 = vld [vmem:[#allocation5 + $0x228] sm:$0xff]  ;;  %v107_v32 = vld [vmem:[#allocation5 + $0x218] sm:$0xff]  ;;  %v360_v34 = vpack.c.bf16 %v100_v26, %v96_v25  ;;  %v424_v35 = vpack.c.bf16 %v102_v29, %v98_v27  ;;  %v104_v37 = vld [vmem:[#allocation5 + $0x200] sm:$0xff] }
  0x3d   :  { %415 = vmatprep.subr.bf16.mxu1 %v414_v4  ;;  %v111_v33 = vld [vmem:[#allocation5 + $0x238] sm:$0xff]  ;;  %v362_v36 = vpack.c.bf16 %v109_v31, %v105_v30  ;;  %v108_v38 = vld [vmem:[#allocation5 + $0x220] sm:$0xff]  ;;  %v106_v39 = vld [vmem:[#allocation5 + $0x210] sm:$0xff] }
  0x3e   :  { %v426_v40 = vpack.c.bf16 %v111_v33, %v107_v32  ;;  %v110_v41 = vld [vmem:[#allocation5 + $0x230] sm:$0xff]  ;;  %v113_v42 = vld [vmem:[#allocation5 + $0x248] sm:$0xff]  ;;  %v115_v44 = vld [vmem:[#allocation5 + $0x258] sm:$0xff]  ;;  %v364_v46 = vpack.c.bf16 %v108_v38, %v104_v37 }
  0x3f   :  { %353 = vmatpush1.bf16.msra.mxu0 %v352_v10  ;;  %v117_v43 = vld [vmem:[#allocation5 + $0x268] sm:$0xff]  ;;  %v119_v45 = vld [vmem:[#allocation5 + $0x278] sm:$0xff]  ;;  %v428_v47 = vpack.c.bf16 %v110_v41, %v106_v39  ;;  %v112_v49 = vld [vmem:[#allocation5 + $0x240] sm:$0xff] }
  0x40   :  { %417 = vmatpush1.bf16.msra.mxu1 %v416_v11  ;;  %355 = vmatprep.subr.bf16.mxu0 %v354_v12  ;;  %v366_v48 = vpack.c.bf16 %v117_v43, %v113_v42  ;;  %v116_v50 = vld [vmem:[#allocation5 + $0x260] sm:$0xff]  ;;  %v114_v51 = vld [vmem:[#allocation5 + $0x250] sm:$0xff]  ;;  %v430_v52 = vpack.c.bf16 %v119_v45, %v115_v44  ;;  %v121_v54 = vld [vmem:[#allocation5 + $0x288] sm:$0xff] }
  0x41   :  { %419 = vmatprep.subr.bf16.mxu1 %v418_v16  ;;  %v118_v53 = vld [vmem:[#allocation5 + $0x270] sm:$0xff]  ;;  %v125_v55 = vld [vmem:[#allocation5 + $0x2a8] sm:$0xff]  ;;  %v123_v56 = vld [vmem:[#allocation5 + $0x298] sm:$0xff]  ;;  %v368_v58 = vpack.c.bf16 %v116_v50, %v112_v49 }
  0x42   :  { %v127_v57 = vld [vmem:[#allocation5 + $0x2b8] sm:$0xff]  ;;  %v432_v59 = vpack.c.bf16 %v118_v53, %v114_v51  ;;  %v370_v60 = vpack.c.bf16 %v125_v55, %v121_v54  ;;  %v120_v61 = vld [vmem:[#allocation5 + $0x280] sm:$0xff]  ;;  %v122_v63 = vld [vmem:[#allocation5 + $0x290] sm:$0xff] }
  0x43   :  { %357 = vmatpush1.bf16.msra.mxu0 %v356_v22  ;;  %v124_v62 = vld [vmem:[#allocation5 + $0x2a0] sm:$0xff]  ;;  %v434_v0 = vpack.c.bf16 %v127_v57, %v123_v56  ;;  %v126_v1 = vld [vmem:[#allocation5 + $0x2b0] sm:$0xff]  ;;  %v129_v2 = vld [vmem:[#allocation5 + $0x2c8] sm:$0xff] }
  0x44   :  { %421 = vmatpush1.bf16.msra.mxu1 %v420_v23  ;;  %359 = vmatprep.subr.bf16.mxu0 %v358_v24  ;;  %v133_v3 = vld [vmem:[#allocation5 + $0x2e8] sm:$0xff]  ;;  %v131_v4 = vld [vmem:[#allocation5 + $0x2d8] sm:$0xff]  ;;  %v372_v6 = vpack.c.bf16 %v124_v62, %v120_v61  ;;  %v128_v7 = vld [vmem:[#allocation5 + $0x2c0] sm:$0xff]  ;;  %v436_v8 = vpack.c.bf16 %v126_v1, %v122_v63 }
  0x45   :  { %423 = vmatprep.subr.bf16.mxu1 %v422_v28  ;;  %v135_v5 = vld [vmem:[#allocation5 + $0x2f8] sm:$0xff]  ;;  %v374_v9 = vpack.c.bf16 %v133_v3, %v129_v2  ;;  %v132_v10 = vld [vmem:[#allocation5 + $0x2e0] sm:$0xff]  ;;  %v130_v11 = vld [vmem:[#allocation5 + $0x2d0] sm:$0xff] }
  0x46   :  { %v134_v12 = vld [vmem:[#allocation5 + $0x2f0] sm:$0xff]  ;;  %v438_v13 = vpack.c.bf16 %v135_v5, %v131_v4  ;;  %v137_v14 = vld [vmem:[#allocation5 + $0x308] sm:$0xff]  ;;  %v39_v16 = vld [vmem:[#allocation2 + $0x8] sm:$0xff]  ;;  %v376_v19 = vpack.c.bf16 %v132_v10, %v128_v7 }
  0x47   :  { %361 = vmatpush1.bf16.msra.mxu0 %v360_v34  ;;  %v141_v15 = vld [vmem:[#allocation5 + $0x328] sm:$0xff]  ;;  %v139_v17 = vld [vmem:[#allocation5 + $0x318] sm:$0xff]  ;;  %232 = vmatprep.mubr.f32.mxu0 %v39_v16  ;;  %v440_v20 = vpack.c.bf16 %v134_v12, %v130_v11  ;;  %v136_v22 = vld [vmem:[#allocation5 + $0x300] sm:$0xff] }
  0x48   :  { %425 = vmatpush1.bf16.msra.mxu1 %v424_v35  ;;  %363 = vmatprep.subr.bf16.mxu0 %v362_v36  ;;  %v143_v18 = vld [vmem:[#allocation5 + $0x338] sm:$0xff]  ;;  %v378_v21 = vpack.c.bf16 %v141_v15, %v137_v14  ;;  %v140_v23 = vld [vmem:[#allocation5 + $0x320] sm:$0xff]  ;;  %v138_v24 = vld [vmem:[#allocation5 + $0x310] sm:$0xff] }
  0x49   :  { %427 = vmatprep.subr.bf16.mxu1 %v426_v40  ;;  %303 = vmatprep.mubr.f32.mxu1 %v39_v16  ;;  %v442_v25 = vpack.c.bf16 %v143_v18, %v139_v17  ;;  %v142_v26 = vld [vmem:[#allocation5 + $0x330] sm:$0xff]  ;;  %v145_v27 = vld [vmem:[#allocation5 + $0x348] sm:$0xff]  ;;  %v147_v29 = vld [vmem:[#allocation5 + $0x358] sm:$0xff]  ;;  %v380_v31 = vpack.c.bf16 %v140_v23, %v136_v22 }
  0x4a   :  { %v149_v28 = vld [vmem:[#allocation5 + $0x368] sm:$0xff]  ;;  %v151_v30 = vld [vmem:[#allocation5 + $0x378] sm:$0xff]  ;;  %v444_v32 = vpack.c.bf16 %v142_v26, %v138_v24  ;;  %v144_v34 = vld [vmem:[#allocation5 + $0x340] sm:$0xff] }
  0x4b   :  { %365 = vmatpush1.bf16.msra.mxu0 %v364_v46  ;;  %v382_v33 = vpack.c.bf16 %v149_v28, %v145_v27  ;;  %v148_v35 = vld [vmem:[#allocation5 + $0x360] sm:$0xff]  ;;  %v146_v36 = vld [vmem:[#allocation5 + $0x350] sm:$0xff]  ;;  %v446_v37 = vpack.c.bf16 %v151_v30, %v147_v29  ;;  %v153_v39 = vld [vmem:[#allocation5 + $0x388] sm:$0xff] }
  0x4c   :  { %429 = vmatpush1.bf16.msra.mxu1 %v428_v47  ;;  %367 = vmatprep.subr.bf16.mxu0 %v366_v48  ;;  %v150_v38 = vld [vmem:[#allocation5 + $0x370] sm:$0xff]  ;;  %v157_v40 = vld [vmem:[#allocation5 + $0x3a8] sm:$0xff]  ;;  %v155_v41 = vld [vmem:[#allocation5 + $0x398] sm:$0xff]  ;;  %v384_v43 = vpack.c.bf16 %v148_v35, %v144_v34 }
  0x4d   :  { %431 = vmatprep.subr.bf16.mxu1 %v430_v52  ;;  %v159_v42 = vld [vmem:[#allocation5 + $0x3b8] sm:$0xff]  ;;  %v448_v44 = vpack.c.bf16 %v150_v38, %v146_v36  ;;  %v386_v45 = vpack.c.bf16 %v157_v40, %v153_v39  ;;  %v152_v46 = vld [vmem:[#allocation5 + $0x380] sm:$0xff]  ;;  %v154_v48 = vld [vmem:[#allocation5 + $0x390] sm:$0xff] }
  0x4e   :  { %v156_v47 = vld [vmem:[#allocation5 + $0x3a0] sm:$0xff]  ;;  %v450_v49 = vpack.c.bf16 %v159_v42, %v155_v41  ;;  %v158_v50 = vld [vmem:[#allocation5 + $0x3b0] sm:$0xff]  ;;  %v161_v51 = vld [vmem:[#allocation5 + $0x3c8] sm:$0xff] }
  0x4f   :  { %369 = vmatpush1.bf16.msra.mxu0 %v368_v58  ;;  %v165_v52 = vld [vmem:[#allocation5 + $0x3e8] sm:$0xff]  ;;  %v163_v53 = vld [vmem:[#allocation5 + $0x3d8] sm:$0xff]  ;;  %v388_v55 = vpack.c.bf16 %v156_v47, %v152_v46  ;;  %v452_v56 = vpack.c.bf16 %v158_v50, %v154_v48  ;;  %v160_v58 = vld [vmem:[#allocation5 + $0x3c0] sm:$0xff] }
  0x50   :  { %433 = vmatpush1.bf16.msra.mxu1 %v432_v59  ;;  %371 = vmatprep.subr.bf16.mxu0 %v370_v60  ;;  %v167_v54 = vld [vmem:[#allocation5 + $0x3f8] sm:$0xff]  ;;  %v390_v57 = vpack.c.bf16 %v165_v52, %v161_v51  ;;  %v164_v59 = vld [vmem:[#allocation5 + $0x3e0] sm:$0xff]  ;;  %v162_v61 = vld [vmem:[#allocation5 + $0x3d0] sm:$0xff] }
  0x51   :  { %435 = vmatprep.subr.bf16.mxu1 %v434_v0  ;;  %v454_v60 = vpack.c.bf16 %v167_v54, %v163_v53  ;;  %v166_v62 = vld [vmem:[#allocation5 + $0x3f0] sm:$0xff]  ;;  %v392_v63 = vpack.c.bf16 %v164_v59, %v160_v58 }
  0x52   :  { %v456_v0 = vpack.c.bf16 %v166_v62, %v162_v61  ;;  %v38_v1 = vld [vmem:[#allocation2] sm:$0xff] }
  0x53   :  { %373 = vmatpush1.bf16.msra.mxu0 %v372_v6 }
  0x54   :  { %437 = vmatpush1.bf16.msra.mxu1 %v436_v8  ;;  %375 = vmatprep.subr.bf16.mxu0 %v374_v9 }
  0x55   :  { %439 = vmatprep.subr.bf16.mxu1 %v438_v13 }
  0x57   :  { %377 = vmatpush1.bf16.msra.mxu0 %v376_v19 }
  0x58   :  { %441 = vmatpush1.bf16.msra.mxu1 %v440_v20  ;;  %379 = vmatprep.subr.bf16.mxu0 %v378_v21 }
  0x59   :  { %443 = vmatprep.subr.bf16.mxu1 %v442_v25 }
  0x5b   :  { %381 = vmatpush1.bf16.msra.mxu0 %v380_v31 }
  0x5c   :  { %445 = vmatpush1.bf16.msra.mxu1 %v444_v32  ;;  %383 = vmatprep.subr.bf16.mxu0 %v382_v33 }
  0x5d   :  { %447 = vmatprep.subr.bf16.mxu1 %v446_v37 }
  0x5f   :  { %385 = vmatpush1.bf16.msra.mxu0 %v384_v43 }
  0x60   :  { %449 = vmatpush1.bf16.msra.mxu1 %v448_v44  ;;  %387 = vmatprep.subr.bf16.mxu0 %v386_v45 }
  0x61   :  { %451 = vmatprep.subr.bf16.mxu1 %v450_v49 }
  0x63   :  { %389 = vmatpush1.bf16.msra.mxu0 %v388_v55 }
  0x64   :  { %453 = vmatpush1.bf16.msra.mxu1 %v452_v56  ;;  %391 = vmatprep.subr.bf16.mxu0 %v390_v57 }
  0x65   :  { %455 = vmatprep.subr.bf16.mxu1 %v454_v60 }
  0x67   :  { %393 = vmatpush1.bf16.msra.mxu0 %v392_v63 }
  0x68   :  { %457 = vmatpush1.bf16.msra.mxu1 %v456_v0 }
  0x6a   :  { %233 = vmatmul.mubr.f32.vlgmr.msra.gmra.mrb[0].mxu0 %v38_v1 }
  0x6b   :  { %304 = vmatmul.mubr.f32.vlgmr.msra.gmra.mrb[0].mxu1 %v38_v1 }
 0x13d   :  { %v234_v2 = vpop.f32.mrb[0].mxu0 }
 0x13e   :  { %310 = vst [vmem:[#allocation7] sm:$0xff] %v234_v2  ;;  %v305_v3 = vpop.f32.mrb[0].mxu1  ;;  %v236_v4 = vpop.f32.mrb[1].mxu0 }
 0x13f   :  { %312 = vst [vmem:[#allocation7 + $0x10] sm:$0xff] %v305_v3  ;;  %311 = vst [vmem:[#allocation7 + $0x8] sm:$0xff] %v236_v4  ;;  %v307_v5 = vpop.f32.mrb[1].mxu1 }
 0x140   :  { %313 = vst [vmem:[#allocation7 + $0x18] sm:$0xff] %v307_v5 }
 0x141   :  { %518 = shalt.err (!%p515_p6)
}
 0x142   :  { %s519_s10 = scalar_lea.hbm %s600_s2, 512 }
 0x143   :  { %p520_p7 = scmp.ne.s32.totalorder %s600_s2, %s519_s10  ;;  %p523_p8 = scmp.lt.u32.totalorder %s519_s10, %s600_s2 }
 0x145   :  { %p525_p9 = pnand %p523_p8, %p520_p7 }
 0x147   :  { %528 = shalt.err (!%p525_p9)
}
 0x148   :  { %323 = dma.vmem_to_hbm [thread:$0]  %s321_s6, 512, %s600_s2, [#allocation4]  }
 0x149   :  { %533 = dma.done.wait [#allocation4], 512  }
 0x14a   :  { %534 = vsyncadd [#allocation4], 4294966784 }
 0x14b   :  { %327 = vsyncpa [#allocation3], 1 }
 0x14c   :  { %328 = vsyncpa [#allocation6], 1 }
 0x14d   :  { %329 = vsyncpa [#allocation4], 1 }

</bundles_post_ra>
